<compile_context>
chip_gen: v5e
topology: v5e:2x2
jax: 0.10.0
libtpu: 0.0.40
codegen_flags: <defaults>
</compile_context>

<pallas_src>
import functools

import jax
import jax.numpy as jnp
from jax.experimental import pallas as pl
from jax.experimental.pallas import tpu as pltpu

_EPS = 1e-6  # nn.PairwiseDistance default eps (added to the difference)


def _tuning():
    """Per-generation block sizing (packed rows / generic bytes per f32 buffer)."""
    kind = ""
    try:
        kind = jax.devices()[0].device_kind.lower()
    except Exception:
        pass
    if "v7" in kind:
        # v7x: highest HBM BW, 32 MiB scoped VMEM default -> 4 MiB per buffer
        # (2 inputs x 2 pipeline buffers = 16 MiB) amortizes per-step overhead best.
        return {"packed_tile": 8192, "row_bytes": 4 << 20}
    # v5e / v6e (and unknown): 2 MiB per f32 buffer -> ~8 MiB of buffers, safely under
    # v5e's 16 MiB scoped-VMEM default while already ~95% overhead-free at its BW.
    return {"packed_tile": 4096, "row_bytes": 2 << 20}


def _pick_tile(n_rows, max_tile, align=32):
    """Row-tile size: full block when tiny; else >=2 grid steps, aligned to `align`."""
    if n_rows <= max(2 * align, 16):
        return n_rows                       # single full-extent block (alignment-exempt)
    half = -(-n_rows // 2)                  # cdiv(n_rows, 2): keep >= 2 grid steps (v7x megacore)
    return min(max_tile, -(-half // align) * align)


def _packed_kernel(sel_ref, redu_ref, pred_ref, gt_ref, out_ref, *, tile, n_rows, needs_mask):
    # pred_ref/gt_ref: (tile, 128) lane-dense tiles; each packed row holds p original rows.
    diff = pred_ref[...].astype(jnp.float32) - gt_ref[...].astype(jnp.float32) + _EPS
    sq = diff * diff                                                    # (tile, 128) VPU
    # Per-original-row squared L2 via the otherwise-idle MXU (no XLU lane reduce).
    row_sq = jnp.dot(sq, sel_ref[...], preferred_element_type=jnp.float32)   # (tile, p)
    d = jnp.sqrt(row_sq)                                                # (tile, p) EUP
    if needs_mask:
        # Only emitted when n_rows % tile != 0: zero padded-garbage rows of the last
        # block BEFORE the row-mixing reduction dot below.
        rows = pl.program_id(0) * tile + jax.lax.broadcasted_iota(jnp.int32, d.shape, 0)
        d = jnp.where(rows < n_rows, d, 0.0)
    # Cross-row reduce on the MXU: redu has ones in row 0, zeros elsewhere -> (8, p)
    # slab whose row 0 holds the per-sub-row partial sums. Lane-/tile-conformant store.
    out_ref[0] = jnp.dot(redu_ref[...], d, preferred_element_type=jnp.float32)


def _rows_kernel(ones_ref, redu_ref, pred_ref, gt_ref, out_ref, *, tile, n_rows, needs_mask):
    # pred_ref/gt_ref: (tile, C) row tiles (generic path).
    diff = pred_ref[...].astype(jnp.float32) - gt_ref[...].astype(jnp.float32) + _EPS
    sq = diff * diff                                                    # (tile, C)
    row_sq = jnp.dot(sq, ones_ref[...], preferred_element_type=jnp.float32)  # (tile, 1) MXU
    d = jnp.sqrt(row_sq)                                                # (tile, 1)
    if needs_mask:
        rows = pl.program_id(0) * tile + jax.lax.broadcasted_iota(jnp.int32, d.shape, 0)
        d = jnp.where(rows < n_rows, d, 0.0)
    out_ref[0] = jnp.dot(redu_ref[...], d, preferred_element_type=jnp.float32)  # (8, 1)


def recon_loss(pred, gt):
    B, V, C = pred.shape
    assert gt.shape == pred.shape
    N = B * V
    pred2 = pred.reshape(N, C)          # free (row-major), native dtype -> streamed as-is
    gt2 = gt.reshape(N, C)

    cfg = _tuning()
    lane_dense = (C <= 128) and (128 % C == 0) and (N % (128 // C) == 0)

    if lane_dense:
        p = 128 // C
        n_rows = N // p
        a = pred2.reshape(n_rows, 128)  # free reshape: same row-major bytes
        b = gt2.reshape(n_rows, 128)
        tile = _pick_tile(n_rows, cfg["packed_tile"])
        # Block-diagonal selector sel[l, j] = 1 iff lane l belongs to sub-row j (hoisted).
        lane = jnp.arange(128, dtype=jnp.int32)[:, None]
        col = jnp.arange(p, dtype=jnp.int32)[None, :]
        const = ((lane // C) == col).astype(jnp.float32)        # (128, p)
        const_spec = pl.BlockSpec((128, p), lambda i: (0, 0))
        in_block = (tile, 128)
        out_minor = p
        kernel = functools.partial(_packed_kernel, tile=tile, n_rows=n_rows,
                                   needs_mask=(n_rows % tile != 0))
    else:
        # TODO(synk): for small C that does not divide 128 (e.g. C=24), optionally pad
        # channels to the next divisor of 128 (pred with 0, gt with +eps so diff+eps==0)
        # and route through the packed path for dense lanes on v7x.
        n_rows = N
        a, b = pred2, gt2
        lanes_padded = -(-C // 128) * 128                       # VMEM rows are lane-padded
        max_rows = max(32, (cfg["row_bytes"] // (lanes_padded * 4)) // 32 * 32)
        tile = _pick_tile(n_rows, max_rows)
        const = jnp.ones((C, 1), jnp.float32)                   # ones column (hoisted)
        const_spec = pl.BlockSpec((C, 1), lambda i: (0, 0))
        in_block = (tile, C)
        out_minor = 1
        kernel = functools.partial(_rows_kernel, tile=tile, n_rows=n_rows,
                                   needs_mask=(n_rows % tile != 0))

    num_tiles = pl.cdiv(n_rows, tile)
    # Reduction row: only row 0 is ones -> slab rows 1..7 are exact zeros.
    redu = jnp.zeros((8, tile), jnp.float32).at[0].set(1.0)

    partials = pl.pallas_call(
        kernel,
        out_shape=jax.ShapeDtypeStruct((num_tiles, 8, out_minor), jnp.float32),
        grid=(num_tiles,),
        in_specs=[
            const_spec,                                           # resident constant
            pl.BlockSpec((8, tile), lambda i: (0, 0)),            # resident constant
            pl.BlockSpec(in_block, lambda i: (i, 0)),
            pl.BlockSpec(in_block, lambda i: (i, 0)),
        ],
        out_specs=pl.BlockSpec((1, 8, out_minor), lambda i: (i, 0, 0)),
        compiler_params=pltpu.CompilerParams(
            dimension_semantics=("parallel",),
            vmem_limit_bytes=32 << 20,
        ),
    )(const, redu, a, b)

    # mean(-1).mean(-1) over (B, V) with uniform V == sum of all distances / (B*V)
    return jnp.sum(partials) / N


if __name__ == "__main__":
    key = jax.random.PRNGKey(0)

    def ref_loss(p, g):
        Bv, Vv, Cv = p.shape
        d = (p.reshape(-1, Cv).astype(jnp.float32)
             - g.reshape(-1, Cv).astype(jnp.float32) + _EPS)
        return jnp.sqrt(jnp.sum(d * d, axis=-1)).reshape(Bv, Vv).mean(-1).mean(-1)

    # 1) Lane-dense packed path, single full block (B, V, C) = (2, 8, 32).
    k1, k2, k3, k4, k5, k6 = jax.random.split(key, 6)
    pred = jax.random.normal(k1, (2, 8, 32), dtype=jnp.float32)
    gt = jax.random.normal(k2, (2, 8, 32), dtype=jnp.float32)
    loss = recon_loss(pred, gt)
    jax.block_until_ready(loss)
    assert jnp.allclose(loss, ref_loss(pred, gt), rtol=2e-5, atol=1e-5), (loss, ref_loss(pred, gt))

    # 2) Lane-dense packed path, multi-tile grid with a partial last block (mask path).
    pred_m = jax.random.normal(k3, (4, 80, 32), dtype=jnp.float32)
    gt_m = jax.random.normal(k4, (4, 80, 32), dtype=jnp.float32)
    loss_m = recon_loss(pred_m, gt_m)
    jax.block_until_ready(loss_m)
    assert jnp.allclose(loss_m, ref_loss(pred_m, gt_m), rtol=2e-5, atol=1e-5), (loss_m, ref_loss(pred_m, gt_m))

    # 3) Generic (N, C) fallback path (C does not divide 128).
    pred_g = jax.random.normal(k5, (2, 8, 24), dtype=jnp.float32)
    gt_g = jax.random.normal(k6, (2, 8, 24), dtype=jnp.float32)
    loss_g = recon_loss(pred_g, gt_g)
    jax.block_until_ready(loss_g)
    assert jnp.allclose(loss_g, ref_loss(pred_g, gt_g), rtol=2e-5, atol=1e-5), (loss_g, ref_loss(pred_g, gt_g))

    print("KERNEL_OK")
</pallas_src>

<mosaic_0001>
module attributes {stable_mosaic.version = 11 : i64} {
  func.func @_packed_kernel(%arg0: i32, %arg1: memref<128x4xf32, #tpu.memory_space<vmem>>, %arg2: memref<8x4xf32, #tpu.memory_space<vmem>>, %arg3: memref<4x128xf32, #tpu.memory_space<vmem>>, %arg4: memref<4x128xf32, #tpu.memory_space<vmem>>, %arg5: memref<1x8x4xf32, #tpu.memory_space<vmem>>) attributes {dimension_semantics = [#tpu.dimension_semantics<parallel>], iteration_bounds = array<i64: 1>, scalar_prefetch = 0 : i64, scratch_operands = 0 : i64, tpu.core_type = #tpu.core_type<tc>, window_params = [{pipeline_mode = #tpu.pipeline_mode<synchronous>, transform_indices = @transform_0, window_bounds = array<i64: 128, 4>}, {pipeline_mode = #tpu.pipeline_mode<synchronous>, transform_indices = @transform_1, window_bounds = array<i64: 8, 4>}, {transform_indices = @transform_2, window_bounds = array<i64: 4, 128>}, {transform_indices = @transform_3, window_bounds = array<i64: 4, 128>}, {transform_indices = @transform_4, window_bounds = array<i64: 1, 8, 4>}]} {
    %c0 = arith.constant 0 : index
    %c0_0 = arith.constant 0 : index
    %0 = vector.load %arg3[%c0, %c0_0] : memref<4x128xf32, #tpu.memory_space<vmem>>, vector<4x128xf32>
    %c0_1 = arith.constant 0 : index
    %c0_2 = arith.constant 0 : index
    %1 = vector.load %arg4[%c0_1, %c0_2] : memref<4x128xf32, #tpu.memory_space<vmem>>, vector<4x128xf32>
    %2 = arith.subf %0, %1 : vector<4x128xf32>
    %cst = arith.constant 9.99999997E-7 : f32
    %3 = vector.broadcast %cst : f32 to vector<4x128xf32>
    %4 = arith.addf %2, %3 : vector<4x128xf32>
    %5 = arith.mulf %4, %4 : vector<4x128xf32>
    %c0_3 = arith.constant 0 : index
    %c0_4 = arith.constant 0 : index
    %6 = vector.load %arg1[%c0_3, %c0_4] : memref<128x4xf32, #tpu.memory_space<vmem>>, vector<128x4xf32>
    %cst_5 = arith.constant dense<0.000000e+00> : vector<4x4xf32>
    %7 = tpu.matmul %5, %6, %cst_5 {dimension_numbers = #tpu.dot_dimension_numbers<[1], [0], [0], [1], [0, 0, 1, 1], [], []>} : vector<4x128xf32>, vector<128x4xf32>, vector<4x4xf32> -> vector<4x4xf32>
    %8 = math.sqrt %7 : vector<4x4xf32>
    %c0_6 = arith.constant 0 : index
    %c0_7 = arith.constant 0 : index
    %9 = vector.load %arg2[%c0_6, %c0_7] : memref<8x4xf32, #tpu.memory_space<vmem>>, vector<8x4xf32>
    %cst_8 = arith.constant dense<0.000000e+00> : vector<8x4xf32>
    %10 = tpu.matmul %9, %8, %cst_8 {dimension_numbers = #tpu.dot_dimension_numbers<[1], [0], [0], [1], [0, 0, 1, 1], [], []>} : vector<8x4xf32>, vector<4x4xf32>, vector<8x4xf32> -> vector<8x4xf32>
    %c0_9 = arith.constant 0 : index
    %c0_10 = arith.constant 0 : index
    %c0_11 = arith.constant 0 : index
    %11 = vector.load %arg5[%c0_9, %c0_10, %c0_11] : memref<1x8x4xf32, #tpu.memory_space<vmem>>, vector<1x8x4xf32>
    %12 = vector.shape_cast %11 : vector<1x8x4xf32> to vector<8x4xf32>
    %13 = vector.shape_cast %10 : vector<8x4xf32> to vector<1x8x4xf32>
    tpu.vector_store %arg5[%c0_9, %c0_10, %c0_11], %13 {strides = array<i32>} : memref<1x8x4xf32, #tpu.memory_space<vmem>>, vector<1x8x4xf32>,
    return
  }
  func.func @transform_0(%arg0: i32) -> (i32, i32) {
    %c0_i32 = arith.constant 0 : i32
    %c0_i32_0 = arith.constant 0 : i32
    %c0_i32_1 = arith.constant 0 : i32
    return %c0_i32, %c0_i32_0 : i32, i32
  }
  func.func @transform_1(%arg0: i32) -> (i32, i32) {
    %c0_i32 = arith.constant 0 : i32
    %c0_i32_0 = arith.constant 0 : i32
    %c0_i32_1 = arith.constant 0 : i32
    return %c0_i32, %c0_i32_0 : i32, i32
  }
  func.func @transform_2(%arg0: i32) -> (i32, i32) {
    %c0_i32 = arith.constant 0 : i32
    %c0_i32_0 = arith.constant 0 : i32
    return %arg0, %c0_i32 : i32, i32
  }
  func.func @transform_3(%arg0: i32) -> (i32, i32) {
    %c0_i32 = arith.constant 0 : i32
    %c0_i32_0 = arith.constant 0 : i32
    return %arg0, %c0_i32 : i32, i32
  }
  func.func @transform_4(%arg0: i32) -> (i32, i32, i32) {
    %c0_i32 = arith.constant 0 : i32
    %c0_i32_0 = arith.constant 0 : i32
    %c0_i32_1 = arith.constant 0 : i32
    return %arg0, %c0_i32, %c0_i32_0 : i32, i32, i32
  }
}

</mosaic_0001>

<bundles_post_ra>
// kernel: tpu_custom_call.1
= control target key start
LH: loop header
LB: loop body
LE: loop exit
PB: predicated region body
PF: predicated region fallthrough
CT: control target
= control target key end

     0   :  { %vm75_vm1 = vcmask 1043456   ;;  %vm71_vm3 = vcmask 31744   ;;  %s193_s0 = inlined_call_operand.vmem [shape: f32[128,4], index: 0, kind: input, shape index: {}]   ;;  %s194_s2 = inlined_call_operand.vmem [shape: f32[4,128], index: 2, kind: input, shape index: {}]   ;;  %s195_s3 = inlined_call_operand.vmem [shape: f32[4,128], index: 3, kind: input, shape index: {}]   ;;  %s196_s1 = inlined_call_operand.vmem [shape: f32[8,4], index: 1, kind: input, shape index: {}]   ;;  %s197_s4 = inlined_call_operand.vmem [shape: f32[1,8,4], index: 4, kind: output, shape index: {}]  }
   0x1   :  { %v37_v0 = vld [vmem:[%s193_s0 + $0x78] sm:$0xff]  ;;  %v36_v1 = vld [vmem:[%s193_s0 + $0x70] sm:$0xff]  ;;  %v35_v2 = vld [vmem:[%s193_s0 + $0x68] sm:$0xff] }
   0x2   :  { %38 = vmatpush.msra.mxu0 %v37_v0  ;;  %v34_v3 = vld [vmem:[%s193_s0 + $0x60] sm:$0xff]  ;;  %v33_v4 = vld [vmem:[%s193_s0 + $0x58] sm:$0xff]  ;;  %v32_v5 = vld [vmem:[%s193_s0 + $0x50] sm:$0xff] }
   0x3   :  { %v31_v6 = vld [vmem:[%s193_s0 + $0x48] sm:$0xff]  ;;  %v30_v7 = vld [vmem:[%s193_s0 + $0x40] sm:$0xff]  ;;  %v29_v8 = vld [vmem:[%s193_s0 + $0x38] sm:$0xff] }
   0x4   :  { %39 = vmatpush.msra.mxu0 %v36_v1  ;;  %v28_v9 = vld [vmem:[%s193_s0 + $0x30] sm:$0xff]  ;;  %v17_v10 = vld [vmem:[%s194_s2] sm:$0xf]  ;;  %v27_v12 = vld [vmem:[%s193_s0 + $0x28] sm:$0xff] }
   0x5   :  { %v18_v11 = vld [vmem:[%s195_s3] sm:$0xf]  ;;  %v25_v15 = vld [vmem:[%s193_s0 + $0x18] sm:$0xff]  ;;  %v24_v16 = vld [vmem:[%s193_s0 + $0x10] sm:$0xff] }
   0x6   :  { %40 = vmatpush.msra.mxu0 %v35_v2  ;;  %v26_v13 = vld [vmem:[%s193_s0 + $0x20] sm:$0xff]  ;;  %v19_v14 = vsub.f32 %v17_v10, %v18_v11  ;;  %v23_v18 = vld [vmem:[%s193_s0 + $0x8] sm:$0xff] }
   0x7   :  { %v22_v19 = vld [vmem:[%s193_s0] sm:$0xff] }
   0x8   :  { %41 = vmatpush.msra.mxu0 %v34_v3  ;;  %v20_v17 = vadd.f32 1e-06, %v19_v14  ;;  %v70_v31 = vld [vmem:[%s196_s1] sm:$0xff] }
   0xa   :  { %42 = vmatpush.msra.mxu0 %v33_v4  ;;  %v21_v20 = vmul.f32 %v20_v17, %v20_v17 }
   0xc   :  { %43 = vmatpush.msra.mxu0 %v32_v5 }
   0xe   :  { %44 = vmatpush.msra.mxu0 %v31_v6 }
  0x10   :  { %45 = vmatpush.msra.mxu0 %v30_v7 }
  0x12   :  { %46 = vmatpush.msra.mxu0 %v29_v8 }
  0x14   :  { %47 = vmatpush.msra.mxu0 %v28_v9 }
  0x16   :  { %48 = vmatpush.msra.mxu0 %v27_v12 }
  0x18   :  { %49 = vmatpush.msra.mxu0 %v26_v13 }
  0x1a   :  { %50 = vmatpush.msra.mxu0 %v25_v15 }
  0x1c   :  { %51 = vmatpush.msra.mxu0 %v24_v16 }
  0x1e   :  { %52 = vmatpush.msra.mxu0 %v23_v18 }
  0x20   :  { %53 = vmatpush.msra.mxu0 %v22_v19 }
  0x21   :  { %54 = vmatmul.f32.vlgmr.msra.gmra.mxu0 %v21_v20 }
  0x9e   :  { %v55_v21 = vpop.f32.mrf.mxu0 }
  0x9f   :  { %106 = vrsqrt.f32 %v55_v21  ;;  %vm65_vm0 = vcmp.eq.f32.partialorder %v55_v21, inf  ;;  %v68_v29 = vand.u32 2147483648, %v55_v21  ;;  %vm67_vm2 = vcmp.eq.f32.partialorder %v55_v21, 0.0 }
  0xa5   :  { %v107_v22 = vpop.eup %106 }
  0xa6   :  { %v59_v23 = vmul.f32 %v107_v22, %v55_v21 }
  0xa8   :  { %v60_v24 = vmul.f32 %v107_v22, %v59_v23 }
  0xaa   :  { %v61_v25 = vmul.f32 0.5, %v60_v24 }
  0xac   :  { %v62_v26 = vsub.f32 1.5, %v61_v25 }
  0xae   :  { %v63_v27 = vmul.f32 %v107_v22, %v62_v26 }
  0xb0   :  { %v64_v28 = vmul.f32 %v63_v27, %v55_v21 }
  0xb2   :  { %v66_v30 = vsel %vm65_vm0, %v55_v21, %v64_v28 }
  0xb3   :  { %v69_v32 = vsel %vm67_vm2, %v68_v29, %v66_v30 }
  0xb4   :  { %104 = vmatpush.msk.msra.mxu1 %vm75_vm1, %v69_v32 }
  0xb5   :  { %105 = vmatmul.msk.f32.vlgmr.msra.gmra.mxu1 %vm71_vm3, %v70_v31 }
 0x132   :  { %v96_v33 = vpop.f32.mrf.mxu1 }
 0x133   :  { %99 = vst.msk [vmem:[%s197_s4] sm:$0xff] %vm71_vm3, %v96_v33 }

</bundles_post_ra>
